<compile_context>
chip_gen: v6e
topology: v6e:2x2x1
jax: 0.10.0
libtpu: 0.0.40
codegen_flags: <defaults>
</compile_context>

<pallas_src>
import functools

import jax
import jax.numpy as jnp
from jax.experimental import pallas as pl
from jax.experimental.pallas import tpu as pltpu

EPS = 1e-5
_F32 = jnp.float32
_BF16 = jnp.bfloat16


# --------------------------------------------------------------------------- #
# in-kernel helpers
# --------------------------------------------------------------------------- #
def _channel_stats(y):
    """y: (C, M) f32 -> (2, C) per-channel [sum ; sum_of_squares] over M.
    Channel-last so the repeated per-grid-step stats store is lane-dense."""
    s = jnp.sum(y, axis=1, keepdims=True)             # (C, 1)
    ss = jnp.sum(y * y, axis=1, keepdims=True)        # (C, 1)
    return jnp.concatenate([s, ss], axis=1).T          # (2, C)


def _affine(y, sb, relu):
    """y: (C, M) f32 ; sb: (C, 2) f32 [scale | bias] -> scale*y + bias (+ReLU)."""
    z = y * sb[:, 0:1] + sb[:, 1:2]
    return jnp.maximum(z, 0.0) if relu else z


def _shift_flat(a, off, hw):
    """a: (C, HW).  out[:, m] = a[:, m + off], zero-filled outside [0, HW)."""
    if off == 0:
        return a
    c = a.shape[0]
    fill = jnp.zeros((c, abs(off)), a.dtype)
    if off > 0:
        return jnp.concatenate([a[:, off:], fill], axis=1)
    return jnp.concatenate([fill, a[:, :hw + off]], axis=1)


# --------------------------------------------------------------------------- #
# stage kernels (each grid step = one batch element, tiles are (C, H*W))
# --------------------------------------------------------------------------- #
def _conv1_kernel(x_ref, w1_ref, y1_ref, st1_ref):
    # 1x1 conv == channel matmul; lane axis = H*W (lane-dense output).
    xb = x_ref[...].astype(_BF16)                                   # (Cin, HW)
    y = jnp.dot(w1_ref[...], xb, preferred_element_type=_F32)       # (width, HW) f32
    st1_ref[...] = _channel_stats(y)        # stats from the f32 accumulator
    y1_ref[...] = y.astype(_BF16)           # bf16 activation stream to HBM


def _conv2_kernel(y1_ref, sb1_ref, w2_ref, y2_ref, st2_ref, *, H, W, width):
    hw = H * W
    # bn1 + relu in f32, one bf16 cast feeding the MXU operand shifts.
    a1 = _affine(y1_ref[...].astype(_F32), sb1_ref[...], relu=True).astype(_BF16)

    # Column coordinate of every lane; masks for the +/-1 horizontal shifts.
    w_idx = jax.lax.broadcasted_iota(jnp.int32, (1, hw), 1) % W
    col_mask = {-1: w_idx >= 1, 0: None, 1: w_idx <= W - 2}

    # 3x3 conv as three K = 3*width matmuls accumulated in f32 registers
    # (no 9*width im2col scratch write + reload).  A flat lane shift by
    # di*W + dj with zero fill handles the vertical (h) border exactly;
    # only the horizontal (w) border needs the mask.
    acc = jnp.zeros((width, hw), _F32)
    for kh in range(3):
        di = kh - 1
        rows = []
        for kw in range(3):
            dj = kw - 1
            shifted = _shift_flat(a1, di * W + dj, hw)
            mask = col_mask[dj]
            if mask is not None:
                shifted = jnp.where(mask, shifted, jnp.zeros_like(shifted))
            rows.append(shifted)
        block = jnp.concatenate(rows, axis=0)                      # (3*width, HW) bf16
        acc = acc + jnp.dot(w2_ref[kh], block, preferred_element_type=_F32)

    st2_ref[...] = _channel_stats(acc)       # stats from the f32 accumulator
    y2_ref[...] = acc.astype(_BF16)


def _conv3_kernel(y2_ref, sb2_ref, w3_ref, y3_ref, st3_ref):
    a2 = _affine(y2_ref[...].astype(_F32), sb2_ref[...], relu=True).astype(_BF16)
    y = jnp.dot(w3_ref[...], a2, preferred_element_type=_F32)       # (Cout, HW) f32
    st3_ref[...] = _channel_stats(y)
    y3_ref[...] = y.astype(_BF16)


def _residual_kernel(x_ref, y3_ref, sb3_ref, o_ref):
    # bn3 + identity residual add (downsample=None path); no ReLU after the add.
    bn3 = _affine(y3_ref[...].astype(_F32), sb3_ref[...], relu=False)
    o_ref[...] = x_ref[...] + bn3


# --------------------------------------------------------------------------- #
# wrapper helpers
# --------------------------------------------------------------------------- #
def _per_sample(*shape):
    """Block = one batch element of an (N, *shape) array (batch dim squeezed)."""
    return pl.BlockSpec((None,) + shape, lambda n: (n,) + (0,) * len(shape))


def _resident(*shape):
    """Whole (small) array resident for every grid step."""
    return pl.BlockSpec(shape, lambda n: (0,) * len(shape))


def _params(tile_bytes):
    """Parallel batch axis (megacore sharding on v7x) + a scoped-VMEM limit
    derived from the running chip's physical VMEM (approx. 2/3 of capacity),
    floored at 4 MiB and scaled from the live per-step tile bytes."""
    try:
        cap = int(pltpu.get_tpu_info().vmem_capacity_bytes)
    except Exception:                      # fallback if the query is unavailable
        cap = 64 * 1024 * 1024
    limit = int(min((2 * cap) // 3, max(4 * 1024 * 1024, 4 * int(tile_bytes))))
    return pltpu.CompilerParams(dimension_semantics=("parallel",),
                                vmem_limit_bytes=limit)


def _bn_scale_bias(stats, gamma, beta, count):
    """Combine per-sample (2, C) [sum; sumsq] partials into per-channel
    (C, 2) [scale | bias] for training-mode BatchNorm (biased var, eps=1e-5)."""
    s = jnp.sum(stats.astype(_F32), axis=0)                     # (2, C)
    mean = s[0] / count
    var = jnp.maximum(s[1] / count - mean * mean, 0.0)
    scale = gamma * jax.lax.rsqrt(var + EPS)
    bias = beta - mean * scale
    return jnp.stack([scale, bias], axis=1).astype(_F32)        # (C, 2)


@jax.jit
def bottleneck_forward(x_nchw, w1, w2, w3, g1, b1, g2, b2, g3, b3):
    N, Cin, H, W = x_nchw.shape
    width = w1.shape[0]
    Cout = w3.shape[0]
    HW = H * W
    # downsample=None path of the module: identity add requires Cin == Cout.
    assert Cin == Cout, "BottleNeck(downsample=None) needs in_planes == planes*expansion"

    # NCHW stays NCHW; (N,C,H,W) -> (N,C,H*W) is a free metadata reshape.
    x = x_nchw.reshape(N, Cin, HW)

    # Matmul-friendly weight layouts, cast to bf16 for the MXU.
    w1m = w1[:, :, 0, 0].astype(_BF16)                                   # (width, Cin)
    # (O,I,Kh,Kw) -> (Kh, O, Kw*I):  w2r[kh][o, kw*width + i] = w2[o, i, kh, kw]
    w2r = jnp.transpose(w2, (2, 0, 3, 1)).reshape(3, width, 3 * width).astype(_BF16)
    w3m = w3[:, :, 0, 0].astype(_BF16)                                   # (Cout, width)

    count = jnp.asarray(N * HW, _F32)

    # ---- conv1 (1x1) + per-sample BN1 partial sums --------------------------
    y1, st1 = pl.pallas_call(
        _conv1_kernel,
        grid=(N,),
        in_specs=[_per_sample(Cin, HW), _resident(width, Cin)],
        out_specs=(_per_sample(width, HW), _per_sample(2, width)),
        out_shape=(jax.ShapeDtypeStruct((N, width, HW), _BF16),
                   jax.ShapeDtypeStruct((N, 2, width), _F32)),
        compiler_params=_params(HW * (4 * Cin + 6 * width)),
        cost_estimate=pl.CostEstimate(
            flops=int(2 * N * HW * Cin * width), transcendentals=0,
            bytes_accessed=int(4 * N * HW * Cin + 2 * N * HW * width
                               + 2 * Cin * width + 8 * N * width)),
    )(x, w1m)
    sb1 = _bn_scale_bias(st1, g1, b1, count)

    # ---- bn1 + relu + conv2 (3x3, three K=3*width matmuls) + BN2 partials ---
    y2, st2 = pl.pallas_call(
        functools.partial(_conv2_kernel, H=H, W=W, width=width),
        grid=(N,),
        in_specs=[_per_sample(width, HW), _resident(width, 2),
                  _resident(3, width, 3 * width)],
        out_specs=(_per_sample(width, HW), _per_sample(2, width)),
        out_shape=(jax.ShapeDtypeStruct((N, width, HW), _BF16),
                   jax.ShapeDtypeStruct((N, 2, width), _F32)),
        compiler_params=_params(HW * width * 20),
        cost_estimate=pl.CostEstimate(
            flops=int(2 * N * HW * 9 * width * width + 6 * N * width * HW),
            transcendentals=0,
            bytes_accessed=int(4 * N * HW * width + 2 * 9 * width * width
                               + 8 * N * width)),
    )(y1, sb1, w2r)
    sb2 = _bn_scale_bias(st2, g2, b2, count)

    # ---- bn2 + relu + conv3 (1x1) + BN3 partials -----------------------------
    y3, st3 = pl.pallas_call(
        _conv3_kernel,
        grid=(N,),
        in_specs=[_per_sample(width, HW), _resident(width, 2),
                  _resident(Cout, width)],
        out_specs=(_per_sample(Cout, HW), _per_sample(2, Cout)),
        out_shape=(jax.ShapeDtypeStruct((N, Cout, HW), _BF16),
                   jax.ShapeDtypeStruct((N, 2, Cout), _F32)),
        compiler_params=_params(HW * (6 * width + 6 * Cout)),
        cost_estimate=pl.CostEstimate(
            flops=int(2 * N * HW * width * Cout), transcendentals=0,
            bytes_accessed=int(2 * N * HW * (width + Cout) + 2 * width * Cout
                               + 8 * N * Cout)),
    )(y2, sb2, w3m)
    sb3 = _bn_scale_bias(st3, g3, b3, count)

    # ---- bn3 + residual add --------------------------------------------------
    out = pl.pallas_call(
        _residual_kernel,
        grid=(N,),
        in_specs=[_per_sample(Cin, HW), _per_sample(Cout, HW), _resident(Cout, 2)],
        out_specs=_per_sample(Cout, HW),
        out_shape=jax.ShapeDtypeStruct((N, Cout, HW), _F32),
        compiler_params=_params(HW * Cout * 12),
        cost_estimate=pl.CostEstimate(
            flops=int(3 * N * Cout * HW), transcendentals=0,
            bytes_accessed=int(4 * N * HW * Cin + 2 * N * HW * Cout
                               + 4 * N * HW * Cout)),
    )(x, y3, sb3)

    return out.reshape(N, Cout, H, W)


# ----------------------------- pure-JAX reference ----------------------------
def reference_forward(x, w1, w2, w3, g1, b1, g2, b2, g3, b3):
    """Independent reference.  Convolutions use bf16 operands with f32
    accumulation (mirroring the kernel's MXU precision); BatchNorm
    (training-mode batch stats) and the residual add are f32."""
    def bn(y, g, b):
        mean = jnp.mean(y, axis=(0, 2, 3), keepdims=True)
        var = jnp.mean((y - mean) ** 2, axis=(0, 2, 3), keepdims=True)
        return (y - mean) * jax.lax.rsqrt(var + EPS) * g.reshape(1, -1, 1, 1) \
            + b.reshape(1, -1, 1, 1)

    dn = ("NCHW", "OIHW", "NCHW")

    def conv(a, w, pad):
        return jax.lax.conv_general_dilated(
            a.astype(jnp.bfloat16), w.astype(jnp.bfloat16),
            window_strides=(1, 1), padding=pad, dimension_numbers=dn,
            preferred_element_type=jnp.float32)

    identity = x
    y = jnp.maximum(bn(conv(x, w1, "VALID"), g1, b1), 0.0)
    y = jnp.maximum(bn(conv(y, w2, [(1, 1), (1, 1)]), g2, b2), 0.0)
    y = bn(conv(y, w3, "VALID"), g3, b3)
    return identity + y   # NOTE: the PyTorch forward() has no ReLU after the add


if __name__ == "__main__":
    # Small config consistent with the bottleneck: in_planes == planes * expansion
    N, in_planes, H, W = 2, 16, 8, 8
    planes, expansion, base_width, groups = 4, 4, 64, 1
    width = int(planes * (base_width / 64.0)) * groups       # 4
    out_planes = planes * expansion                           # 16 == in_planes

    key = jax.random.PRNGKey(0)
    ks = jax.random.split(key, 4)
    x = jax.random.normal(ks[0], (N, in_planes, H, W), jnp.float32)
    w1 = 0.1 * jax.random.normal(ks[1], (width, in_planes, 1, 1), jnp.float32)
    w2 = 0.1 * jax.random.normal(ks[2], (width, width, 3, 3), jnp.float32)
    w3 = 0.1 * jax.random.normal(ks[3], (out_planes, width, 1, 1), jnp.float32)
    # BatchNorm affine params at PyTorch defaults (gamma=1, beta=0)
    g1 = jnp.ones((width,), jnp.float32); b1 = jnp.zeros((width,), jnp.float32)
    g2 = jnp.ones((width,), jnp.float32); b2 = jnp.zeros((width,), jnp.float32)
    g3 = jnp.ones((out_planes,), jnp.float32); b3 = jnp.zeros((out_planes,), jnp.float32)

    out = bottleneck_forward(x, w1, w2, w3, g1, b1, g2, b2, g3, b3)
    out = jax.block_until_ready(out)

    ref = reference_forward(x, w1, w2, w3, g1, b1, g2, b2, g3, b3)
    assert out.shape == (N, out_planes, H, W), out.shape
    # Tolerance reflects bf16 MXU operands AND bf16 inter-stage activation
    # storage (per perf guidance); BN stats, normalization and residual are f32.
    max_err = float(jnp.max(jnp.abs(out - ref)))
    assert jnp.allclose(out, ref, rtol=3e-2, atol=3e-2), max_err

    print("KERNEL_OK")
</pallas_src>

<mosaic_0001>
module attributes {stable_mosaic.version = 11 : i64} {
  func.func @_conv1_kernel(%arg0: i32, %arg1: memref<1x16x64xf32, #tpu.memory_space<vmem>>, %arg2: memref<4x16xbf16, #tpu.memory_space<vmem>>, %arg3: memref<1x4x64xbf16, #tpu.memory_space<vmem>>, %arg4: memref<1x2x4xf32, #tpu.memory_space<vmem>>) attributes {dimension_semantics = [#tpu.dimension_semantics<parallel>], iteration_bounds = array<i64: 2>, scalar_prefetch = 0 : i64, scratch_operands = 0 : i64, tpu.core_type = #tpu.core_type<tc>, window_params = [{transform_indices = @transform_0, window_bounds = array<i64: 1, 16, 64>}, {pipeline_mode = #tpu.pipeline_mode<synchronous>, transform_indices = @transform_1, window_bounds = array<i64: 4, 16>}, {transform_indices = @transform_2, window_bounds = array<i64: 1, 4, 64>}, {transform_indices = @transform_3, window_bounds = array<i64: 1, 2, 4>}]} {
    %c0 = arith.constant 0 : index
    %c0_0 = arith.constant 0 : index
    %c0_1 = arith.constant 0 : index
    %0 = vector.load %arg1[%c0, %c0_0, %c0_1] : memref<1x16x64xf32, #tpu.memory_space<vmem>>, vector<1x16x64xf32>
    %1 = vector.shape_cast %0 : vector<1x16x64xf32> to vector<16x64xf32>
    %2 = arith.truncf %1 : vector<16x64xf32> to vector<16x64xbf16>
    %c0_2 = arith.constant 0 : index
    %c0_3 = arith.constant 0 : index
    %3 = vector.load %arg2[%c0_2, %c0_3] : memref<4x16xbf16, #tpu.memory_space<vmem>>, vector<4x16xbf16>
    %cst = arith.constant dense<0.000000e+00> : vector<4x64xf32>
    %4 = tpu.matmul %3, %2, %cst {dimension_numbers = #tpu.dot_dimension_numbers<[1], [0], [0], [1], [0, 0, 1, 1], [], []>} : vector<4x16xbf16>, vector<16x64xbf16>, vector<4x64xf32> -> vector<4x64xf32>
    %cst_4 = arith.constant dense<0.000000e+00> : vector<4xf32>
    %5 = vector.multi_reduction <add>, %4, %cst_4 [1] : vector<4x64xf32> to vector<4xf32>
    %6 = vector.shape_cast %5 : vector<4xf32> to vector<4x1xf32>
    %7 = arith.mulf %4, %4 : vector<4x64xf32>
    %cst_5 = arith.constant dense<0.000000e+00> : vector<4xf32>
    %8 = vector.multi_reduction <add>, %7, %cst_5 [1] : vector<4x64xf32> to vector<4xf32>
    %9 = vector.shape_cast %8 : vector<4xf32> to vector<4x1xf32>
    %10 = tpu.concatenate %6, %9 in 1 : vector<4x1xf32>, vector<4x1xf32> -> vector<4x2xf32>
    %11 = tpu.transpose %10, [1, 0] : vector<4x2xf32> -> vector<2x4xf32>
    %c0_6 = arith.constant 0 : index
    %c0_7 = arith.constant 0 : index
    %c0_8 = arith.constant 0 : index
    %12 = vector.load %arg4[%c0_6, %c0_7, %c0_8] : memref<1x2x4xf32, #tpu.memory_space<vmem>>, vector<1x2x4xf32>
    %13 = vector.shape_cast %12 : vector<1x2x4xf32> to vector<2x4xf32>
    %14 = vector.shape_cast %11 : vector<2x4xf32> to vector<1x2x4xf32>
    tpu.vector_store %arg4[%c0_6, %c0_7, %c0_8], %14 {strides = array<i32>} : memref<1x2x4xf32, #tpu.memory_space<vmem>>, vector<1x2x4xf32>,
    %15 = arith.truncf %4 : vector<4x64xf32> to vector<4x64xbf16>
    %c0_9 = arith.constant 0 : index
    %c0_10 = arith.constant 0 : index
    %c0_11 = arith.constant 0 : index
    %16 = vector.load %arg3[%c0_9, %c0_10, %c0_11] : memref<1x4x64xbf16, #tpu.memory_space<vmem>>, vector<1x4x64xbf16>
    %17 = vector.shape_cast %16 : vector<1x4x64xbf16> to vector<4x64xbf16>
    %18 = vector.shape_cast %15 : vector<4x64xbf16> to vector<1x4x64xbf16>
    tpu.vector_store %arg3[%c0_9, %c0_10, %c0_11], %18 {strides = array<i32>} : memref<1x4x64xbf16, #tpu.memory_space<vmem>>, vector<1x4x64xbf16>,
    return
  }
  func.func @transform_0(%arg0: i32) -> (i32, i32, i32) {
    %c0_i32 = arith.constant 0 : i32
    %c0_i32_0 = arith.constant 0 : i32
    %c0_i32_1 = arith.constant 0 : i32
    return %arg0, %c0_i32, %c0_i32_0 : i32, i32, i32
  }
  func.func @transform_1(%arg0: i32) -> (i32, i32) {
    %c0_i32 = arith.constant 0 : i32
    %c0_i32_0 = arith.constant 0 : i32
    %c0_i32_1 = arith.constant 0 : i32
    return %c0_i32, %c0_i32_0 : i32, i32
  }
  func.func @transform_2(%arg0: i32) -> (i32, i32, i32) {
    %c0_i32 = arith.constant 0 : i32
    %c0_i32_0 = arith.constant 0 : i32
    %c0_i32_1 = arith.constant 0 : i32
    return %arg0, %c0_i32, %c0_i32_0 : i32, i32, i32
  }
  func.func @transform_3(%arg0: i32) -> (i32, i32, i32) {
    %c0_i32 = arith.constant 0 : i32
    %c0_i32_0 = arith.constant 0 : i32
    %c0_i32_1 = arith.constant 0 : i32
    return %arg0, %c0_i32, %c0_i32_0 : i32, i32, i32
  }
}

module attributes {stable_mosaic.version = 11 : i64} {
  func.func @_conv3_kernel(%arg0: i32, %arg1: memref<1x4x64xbf16, #tpu.memory_space<vmem>>, %arg2: memref<4x2xf32, #tpu.memory_space<vmem>>, %arg3: memref<16x4xbf16, #tpu.memory_space<vmem>>, %arg4: memref<1x16x64xbf16, #tpu.memory_space<vmem>>, %arg5: memref<1x2x16xf32, #tpu.memory_space<vmem>>) attributes {dimension_semantics = [#tpu.dimension_semantics<parallel>], iteration_bounds = array<i64: 2>, scalar_prefetch = 0 : i64, scratch_operands = 0 : i64, tpu.core_type = #tpu.core_type<tc>, window_params = [{transform_indices = @transform_0, window_bounds = array<i64: 1, 4, 64>}, {pipeline_mode = #tpu.pipeline_mode<synchronous>, transform_indices = @transform_1, window_bounds = array<i64: 4, 2>}, {pipeline_mode = #tpu.pipeline_mode<synchronous>, transform_indices = @transform_2, window_bounds = array<i64: 16, 4>}, {transform_indices = @transform_3, window_bounds = array<i64: 1, 16, 64>}, {transform_indices = @transform_4, window_bounds = array<i64: 1, 2, 16>}]} {
    %c0 = arith.constant 0 : index
    %c0_0 = arith.constant 0 : index
    %c0_1 = arith.constant 0 : index
    %0 = vector.load %arg1[%c0, %c0_0, %c0_1] : memref<1x4x64xbf16, #tpu.memory_space<vmem>>, vector<1x4x64xbf16>
    %1 = vector.shape_cast %0 : vector<1x4x64xbf16> to vector<4x64xbf16>
    %2 = arith.extf %1 : vector<4x64xbf16> to vector<4x64xf32>
    %c0_2 = arith.constant 0 : index
    %c0_3 = arith.constant 0 : index
    %3 = vector.load %arg2[%c0_2, %c0_3] : memref<4x2xf32, #tpu.memory_space<vmem>>, vector<4x2xf32>
    %4 = vector.extract_strided_slice %3 {offsets = [0, 0], sizes = [4, 1], strides = [1, 1]} : vector<4x2xf32> to vector<4x1xf32>
    %5 = vector.broadcast %4 : vector<4x1xf32> to vector<4x64xf32>
    %6 = arith.mulf %2, %5 : vector<4x64xf32>
    %7 = vector.extract_strided_slice %3 {offsets = [0, 1], sizes = [4, 1], strides = [1, 1]} : vector<4x2xf32> to vector<4x1xf32>
    %8 = vector.broadcast %7 : vector<4x1xf32> to vector<4x64xf32>
    %9 = arith.addf %6, %8 : vector<4x64xf32>
    %cst = arith.constant 0.000000e+00 : f32
    %10 = vector.broadcast %cst : f32 to vector<4x64xf32>
    %11 = arith.maximumf %9, %10 : vector<4x64xf32>
    %12 = arith.truncf %11 : vector<4x64xf32> to vector<4x64xbf16>
    %c0_4 = arith.constant 0 : index
    %c0_5 = arith.constant 0 : index
    %13 = vector.load %arg3[%c0_4, %c0_5] : memref<16x4xbf16, #tpu.memory_space<vmem>>, vector<16x4xbf16>
    %cst_6 = arith.constant dense<0.000000e+00> : vector<16x64xf32>
    %14 = tpu.matmul %13, %12, %cst_6 {dimension_numbers = #tpu.dot_dimension_numbers<[1], [0], [0], [1], [0, 0, 1, 1], [], []>} : vector<16x4xbf16>, vector<4x64xbf16>, vector<16x64xf32> -> vector<16x64xf32>
    %cst_7 = arith.constant dense<0.000000e+00> : vector<16xf32>
    %15 = vector.multi_reduction <add>, %14, %cst_7 [1] : vector<16x64xf32> to vector<16xf32>
    %16 = vector.shape_cast %15 : vector<16xf32> to vector<16x1xf32>
    %17 = arith.mulf %14, %14 : vector<16x64xf32>
    %cst_8 = arith.constant dense<0.000000e+00> : vector<16xf32>
    %18 = vector.multi_reduction <add>, %17, %cst_8 [1] : vector<16x64xf32> to vector<16xf32>
    %19 = vector.shape_cast %18 : vector<16xf32> to vector<16x1xf32>
    %20 = tpu.concatenate %16, %19 in 1 : vector<16x1xf32>, vector<16x1xf32> -> vector<16x2xf32>
    %21 = tpu.transpose %20, [1, 0] : vector<16x2xf32> -> vector<2x16xf32>
    %c0_9 = arith.constant 0 : index
    %c0_10 = arith.constant 0 : index
    %c0_11 = arith.constant 0 : index
    %22 = vector.load %arg5[%c0_9, %c0_10, %c0_11] : memref<1x2x16xf32, #tpu.memory_space<vmem>>, vector<1x2x16xf32>
    %23 = vector.shape_cast %22 : vector<1x2x16xf32> to vector<2x16xf32>
    %24 = vector.shape_cast %21 : vector<2x16xf32> to vector<1x2x16xf32>
    tpu.vector_store %arg5[%c0_9, %c0_10, %c0_11], %24 {strides = array<i32>} : memref<1x2x16xf32, #tpu.memory_space<vmem>>, vector<1x2x16xf32>,
    %25 = arith.truncf %14 : vector<16x64xf32> to vector<16x64xbf16>
    %c0_12 = arith.constant 0 : index
    %c0_13 = arith.constant 0 : index
    %c0_14 = arith.constant 0 : index
    %26 = vector.load %arg4[%c0_12, %c0_13, %c0_14] : memref<1x16x64xbf16, #tpu.memory_space<vmem>>, vector<1x16x64xbf16>
    %27 = vector.shape_cast %26 : vector<1x16x64xbf16> to vector<16x64xbf16>
    %28 = vector.shape_cast %25 : vector<16x64xbf16> to vector<1x16x64xbf16>
    tpu.vector_store %arg4[%c0_12, %c0_13, %c0_14], %28 {strides = array<i32>} : memref<1x16x64xbf16, #tpu.memory_space<vmem>>, vector<1x16x64xbf16>,
    return
  }
  func.func @transform_0(%arg0: i32) -> (i32, i32, i32) {
    %c0_i32 = arith.constant 0 : i32
    %c0_i32_0 = arith.constant 0 : i32
    %c0_i32_1 = arith.constant 0 : i32
    return %arg0, %c0_i32, %c0_i32_0 : i32, i32, i32
  }
  func.func @transform_1(%arg0: i32) -> (i32, i32) {
    %c0_i32 = arith.constant 0 : i32
    %c0_i32_0 = arith.constant 0 : i32
    %c0_i32_1 = arith.constant 0 : i32
    return %c0_i32, %c0_i32_0 : i32, i32
  }
  func.func @transform_2(%arg0: i32) -> (i32, i32) {
    %c0_i32 = arith.constant 0 : i32
    %c0_i32_0 = arith.constant 0 : i32
    %c0_i32_1 = arith.constant 0 : i32
    return %c0_i32, %c0_i32_0 : i32, i32
  }
  func.func @transform_3(%arg0: i32) -> (i32, i32, i32) {
    %c0_i32 = arith.constant 0 : i32
    %c0_i32_0 = arith.constant 0 : i32
    %c0_i32_1 = arith.constant 0 : i32
    return %arg0, %c0_i32, %c0_i32_0 : i32, i32, i32
  }
  func.func @transform_4(%arg0: i32) -> (i32, i32, i32) {
    %c0_i32 = arith.constant 0 : i32
    %c0_i32_0 = arith.constant 0 : i32
    %c0_i32_1 = arith.constant 0 : i32
    return %arg0, %c0_i32, %c0_i32_0 : i32, i32, i32
  }
}

module attributes {stable_mosaic.version = 11 : i64} {
  func.func @_conv2_kernel(%arg0: i32, %arg1: memref<1x4x64xbf16, #tpu.memory_space<vmem>>, %arg2: memref<4x2xf32, #tpu.memory_space<vmem>>, %arg3: memref<3x4x12xbf16, #tpu.memory_space<vmem>>, %arg4: memref<1x4x64xbf16, #tpu.memory_space<vmem>>, %arg5: memref<1x2x4xf32, #tpu.memory_space<vmem>>) attributes {dimension_semantics = [#tpu.dimension_semantics<parallel>], iteration_bounds = array<i64: 2>, scalar_prefetch = 0 : i64, scratch_operands = 0 : i64, tpu.core_type = #tpu.core_type<tc>, window_params = [{transform_indices = @transform_0, window_bounds = array<i64: 1, 4, 64>}, {pipeline_mode = #tpu.pipeline_mode<synchronous>, transform_indices = @transform_1, window_bounds = array<i64: 4, 2>}, {pipeline_mode = #tpu.pipeline_mode<synchronous>, transform_indices = @transform_2, window_bounds = array<i64: 3, 4, 12>}, {transform_indices = @transform_3, window_bounds = array<i64: 1, 4, 64>}, {transform_indices = @transform_4, window_bounds = array<i64: 1, 2, 4>}]} {
    %c0 = arith.constant 0 : index
    %c0_0 = arith.constant 0 : index
    %c0_1 = arith.constant 0 : index
    %0 = vector.load %arg1[%c0, %c0_0, %c0_1] : memref<1x4x64xbf16, #tpu.memory_space<vmem>>, vector<1x4x64xbf16>
    %1 = vector.shape_cast %0 : vector<1x4x64xbf16> to vector<4x64xbf16>
    %2 = arith.extf %1 : vector<4x64xbf16> to vector<4x64xf32>
    %c0_2 = arith.constant 0 : index
    %c0_3 = arith.constant 0 : index
    %3 = vector.load %arg2[%c0_2, %c0_3] : memref<4x2xf32, #tpu.memory_space<vmem>>, vector<4x2xf32>
    %4 = vector.extract_strided_slice %3 {offsets = [0, 0], sizes = [4, 1], strides = [1, 1]} : vector<4x2xf32> to vector<4x1xf32>
    %5 = vector.broadcast %4 : vector<4x1xf32> to vector<4x64xf32>
    %6 = arith.mulf %2, %5 : vector<4x64xf32>
    %7 = vector.extract_strided_slice %3 {offsets = [0, 1], sizes = [4, 1], strides = [1, 1]} : vector<4x2xf32> to vector<4x1xf32>
    %8 = vector.broadcast %7 : vector<4x1xf32> to vector<4x64xf32>
    %9 = arith.addf %6, %8 : vector<4x64xf32>
    %cst = arith.constant 0.000000e+00 : f32
    %10 = vector.broadcast %cst : f32 to vector<4x64xf32>
    %11 = arith.maximumf %9, %10 : vector<4x64xf32>
    %12 = arith.truncf %11 : vector<4x64xf32> to vector<4x64xbf16>
    %13 = tpu.iota {dimensions = array<i32: 1>} : vector<1x64xi32>
    %c8_i32 = arith.constant 8 : i32
    %c0_i32 = arith.constant 0 : i32
    %14 = arith.cmpi eq, %c8_i32, %c0_i32 : i32
    %c1_i32 = arith.constant 1 : i32
    %15 = arith.select %14, %c1_i32, %c8_i32 : i32
    %16 = vector.broadcast %15 : i32 to vector<1x64xi32>
    %17 = arith.remsi %13, %16 : vector<1x64xi32>
    %c0_i32_4 = arith.constant 0 : i32
    %18 = vector.broadcast %c0_i32_4 : i32 to vector<1x64xi32>
    %19 = arith.cmpi ne, %17, %18 : vector<1x64xi32>
    %c0_i32_5 = arith.constant 0 : i32
    %20 = vector.broadcast %c0_i32_5 : i32 to vector<1x64xi32>
    %21 = arith.cmpi slt, %17, %20 : vector<1x64xi32>
    %c0_i32_6 = arith.constant 0 : i32
    %22 = arith.cmpi slt, %15, %c0_i32_6 : i32
    %23 = vector.broadcast %22 : i1 to vector<1x64xi1>
    %24 = vector.broadcast %23 : vector<1x64xi1> to vector<1x64xi1>
    %25 = arith.xori %21, %24 : vector<1x64xi1>
    %26 = arith.andi %25, %19 : vector<1x64xi1>
    %27 = vector.broadcast %15 : i32 to vector<1x64xi32>
    %28 = arith.addi %17, %27 : vector<1x64xi32>
    %29 = arith.select %26, %28, %17 : vector<1x64xi1>, vector<1x64xi32>
    %c1_i32_7 = arith.constant 1 : i32
    %30 = vector.broadcast %c1_i32_7 : i32 to vector<1x64xi32>
    %31 = arith.cmpi sge, %29, %30 : vector<1x64xi32>
    %c6_i32 = arith.constant 6 : i32
    %32 = vector.broadcast %c6_i32 : i32 to vector<1x64xi32>
    %33 = arith.cmpi sle, %29, %32 : vector<1x64xi32>
    %cst_8 = arith.constant 0.000000e+00 : f32
    %34 = vector.broadcast %cst_8 : f32 to vector<4x64xf32>
    %cst_9 = arith.constant 0.000000e+00 : bf16
    %35 = vector.broadcast %cst_9 : bf16 to vector<4x9xbf16>
    %36 = vector.extract_strided_slice %12 {offsets = [0, 0], sizes = [4, 55], strides = [1, 1]} : vector<4x64xbf16> to vector<4x55xbf16>
    %37 = tpu.concatenate %35, %36 in 1 : vector<4x9xbf16>, vector<4x55xbf16> -> vector<4x64xbf16>
    %cst_10 = arith.constant 0.000000e+00 : bf16
    %38 = vector.broadcast %cst_10 : bf16 to vector<4x64xbf16>
    %39 = vector.shape_cast %31 : vector<1x64xi1> to vector<1x64xi1>
    %40 = vector.broadcast %39 : vector<1x64xi1> to vector<4x64xi1>
    %41 = arith.select %40, %37, %38 : vector<4x64xi1>, vector<4x64xbf16>
    %cst_11 = arith.constant 0.000000e+00 : bf16
    %42 = vector.broadcast %cst_11 : bf16 to vector<4x8xbf16>
    %43 = vector.extract_strided_slice %12 {offsets = [0, 0], sizes = [4, 56], strides = [1, 1]} : vector<4x64xbf16> to vector<4x56xbf16>
    %44 = tpu.concatenate %42, %43 in 1 : vector<4x8xbf16>, vector<4x56xbf16> -> vector<4x64xbf16>
    %cst_12 = arith.constant 0.000000e+00 : bf16
    %45 = vector.broadcast %cst_12 : bf16 to vector<4x7xbf16>
    %46 = vector.extract_strided_slice %12 {offsets = [0, 0], sizes = [4, 57], strides = [1, 1]} : vector<4x64xbf16> to vector<4x57xbf16>
    %47 = tpu.concatenate %45, %46 in 1 : vector<4x7xbf16>, vector<4x57xbf16> -> vector<4x64xbf16>
    %cst_13 = arith.constant 0.000000e+00 : bf16
    %48 = vector.broadcast %cst_13 : bf16 to vector<4x64xbf16>
    %49 = vector.shape_cast %33 : vector<1x64xi1> to vector<1x64xi1>
    %50 = vector.broadcast %49 : vector<1x64xi1> to vector<4x64xi1>
    %51 = arith.select %50, %47, %48 : vector<4x64xi1>, vector<4x64xbf16>
    %52 = tpu.concatenate %41, %44, %51 in 0 : vector<4x64xbf16>, vector<4x64xbf16>, vector<4x64xbf16> -> vector<12x64xbf16>
    %c0_14 = arith.constant 0 : index
    %c0_15 = arith.constant 0 : index
    %c0_16 = arith.constant 0 : index
    %53 = vector.load %arg3[%c0_14, %c0_15, %c0_16] : memref<3x4x12xbf16, #tpu.memory_space<vmem>>, vector<1x4x12xbf16>
    %54 = vector.shape_cast %53 : vector<1x4x12xbf16> to vector<4x12xbf16>
    %cst_17 = arith.constant dense<0.000000e+00> : vector<4x64xf32>
    %55 = tpu.matmul %54, %52, %cst_17 {dimension_numbers = #tpu.dot_dimension_numbers<[1], [0], [0], [1], [0, 0, 1, 1], [], []>} : vector<4x12xbf16>, vector<12x64xbf16>, vector<4x64xf32> -> vector<4x64xf32>
    %56 = arith.addf %34, %55 : vector<4x64xf32>
    %cst_18 = arith.constant 0.000000e+00 : bf16
    %57 = vector.broadcast %cst_18 : bf16 to vector<4x1xbf16>
    %58 = vector.extract_strided_slice %12 {offsets = [0, 0], sizes = [4, 63], strides = [1, 1]} : vector<4x64xbf16> to vector<4x63xbf16>
    %59 = tpu.concatenate %57, %58 in 1 : vector<4x1xbf16>, vector<4x63xbf16> -> vector<4x64xbf16>
    %cst_19 = arith.constant 0.000000e+00 : bf16
    %60 = vector.broadcast %cst_19 : bf16 to vector<4x64xbf16>
    %61 = vector.shape_cast %31 : vector<1x64xi1> to vector<1x64xi1>
    %62 = vector.broadcast %61 : vector<1x64xi1> to vector<4x64xi1>
    %63 = arith.select %62, %59, %60 : vector<4x64xi1>, vector<4x64xbf16>
    %cst_20 = arith.constant 0.000000e+00 : bf16
    %64 = vector.broadcast %cst_20 : bf16 to vector<4x1xbf16>
    %65 = vector.extract_strided_slice %12 {offsets = [0, 1], sizes = [4, 63], strides = [1, 1]} : vector<4x64xbf16> to vector<4x63xbf16>
    %66 = tpu.concatenate %65, %64 in 1 : vector<4x63xbf16>, vector<4x1xbf16> -> vector<4x64xbf16>
    %cst_21 = arith.constant 0.000000e+00 : bf16
    %67 = vector.broadcast %cst_21 : bf16 to vector<4x64xbf16>
    %68 = vector.shape_cast %33 : vector<1x64xi1> to vector<1x64xi1>
    %69 = vector.broadcast %68 : vector<1x64xi1> to vector<4x64xi1>
    %70 = arith.select %69, %66, %67 : vector<4x64xi1>, vector<4x64xbf16>
    %71 = tpu.concatenate %63, %12, %70 in 0 : vector<4x64xbf16>, vector<4x64xbf16>, vector<4x64xbf16> -> vector<12x64xbf16>
    %c1 = arith.constant 1 : index
    %c0_22 = arith.constant 0 : index
    %c0_23 = arith.constant 0 : index
    %72 = vector.load %arg3[%c1, %c0_22, %c0_23] : memref<3x4x12xbf16, #tpu.memory_space<vmem>>, vector<1x4x12xbf16>
    %73 = vector.shape_cast %72 : vector<1x4x12xbf16> to vector<4x12xbf16>
    %cst_24 = arith.constant dense<0.000000e+00> : vector<4x64xf32>
    %74 = tpu.matmul %73, %71, %cst_24 {dimension_numbers = #tpu.dot_dimension_numbers<[1], [0], [0], [1], [0, 0, 1, 1], [], []>} : vector<4x12xbf16>, vector<12x64xbf16>, vector<4x64xf32> -> vector<4x64xf32>
    %75 = arith.addf %56, %74 : vector<4x64xf32>
    %cst_25 = arith.constant 0.000000e+00 : bf16
    %76 = vector.broadcast %cst_25 : bf16 to vector<4x7xbf16>
    %77 = vector.extract_strided_slice %12 {offsets = [0, 7], sizes = [4, 57], strides = [1, 1]} : vector<4x64xbf16> to vector<4x57xbf16>
    %78 = tpu.concatenate %77, %76 in 1 : vector<4x57xbf16>, vector<4x7xbf16> -> vector<4x64xbf16>
    %cst_26 = arith.constant 0.000000e+00 : bf16
    %79 = vector.broadcast %cst_26 : bf16 to vector<4x64xbf16>
    %80 = vector.shape_cast %31 : vector<1x64xi1> to vector<1x64xi1>
    %81 = vector.broadcast %80 : vector<1x64xi1> to vector<4x64xi1>
    %82 = arith.select %81, %78, %79 : vector<4x64xi1>, vector<4x64xbf16>
    %cst_27 = arith.constant 0.000000e+00 : bf16
    %83 = vector.broadcast %cst_27 : bf16 to vector<4x8xbf16>
    %84 = vector.extract_strided_slice %12 {offsets = [0, 8], sizes = [4, 56], strides = [1, 1]} : vector<4x64xbf16> to vector<4x56xbf16>
    %85 = tpu.concatenate %84, %83 in 1 : vector<4x56xbf16>, vector<4x8xbf16> -> vector<4x64xbf16>
    %cst_28 = arith.constant 0.000000e+00 : bf16
    %86 = vector.broadcast %cst_28 : bf16 to vector<4x9xbf16>
    %87 = vector.extract_strided_slice %12 {offsets = [0, 9], sizes = [4, 55], strides = [1, 1]} : vector<4x64xbf16> to vector<4x55xbf16>
    %88 = tpu.concatenate %87, %86 in 1 : vector<4x55xbf16>, vector<4x9xbf16> -> vector<4x64xbf16>
    %cst_29 = arith.constant 0.000000e+00 : bf16
    %89 = vector.broadcast %cst_29 : bf16 to vector<4x64xbf16>
    %90 = vector.shape_cast %33 : vector<1x64xi1> to vector<1x64xi1>
    %91 = vector.broadcast %90 : vector<1x64xi1> to vector<4x64xi1>
    %92 = arith.select %91, %88, %89 : vector<4x64xi1>, vector<4x64xbf16>
    %93 = tpu.concatenate %82, %85, %92 in 0 : vector<4x64xbf16>, vector<4x64xbf16>, vector<4x64xbf16> -> vector<12x64xbf16>
    %c2 = arith.constant 2 : index
    %c0_30 = arith.constant 0 : index
    %c0_31 = arith.constant 0 : index
    %94 = vector.load %arg3[%c2, %c0_30, %c0_31] : memref<3x4x12xbf16, #tpu.memory_space<vmem>>, vector<1x4x12xbf16>
    %95 = vector.shape_cast %94 : vector<1x4x12xbf16> to vector<4x12xbf16>
    %cst_32 = arith.constant dense<0.000000e+00> : vector<4x64xf32>
    %96 = tpu.matmul %95, %93, %cst_32 {dimension_numbers = #tpu.dot_dimension_numbers<[1], [0], [0], [1], [0, 0, 1, 1], [], []>} : vector<4x12xbf16>, vector<12x64xbf16>, vector<4x64xf32> -> vector<4x64xf32>
    %97 = arith.addf %75, %96 : vector<4x64xf32>
    %cst_33 = arith.constant dense<0.000000e+00> : vector<4xf32>
    %98 = vector.multi_reduction <add>, %97, %cst_33 [1] : vector<4x64xf32> to vector<4xf32>
    %99 = vector.shape_cast %98 : vector<4xf32> to vector<4x1xf32>
    %100 = arith.mulf %97, %97 : vector<4x64xf32>
    %cst_34 = arith.constant dense<0.000000e+00> : vector<4xf32>
    %101 = vector.multi_reduction <add>, %100, %cst_34 [1] : vector<4x64xf32> to vector<4xf32>
    %102 = vector.shape_cast %101 : vector<4xf32> to vector<4x1xf32>
    %103 = tpu.concatenate %99, %102 in 1 : vector<4x1xf32>, vector<4x1xf32> -> vector<4x2xf32>
    %104 = tpu.transpose %103, [1, 0] : vector<4x2xf32> -> vector<2x4xf32>
    %c0_35 = arith.constant 0 : index
    %c0_36 = arith.constant 0 : index
    %c0_37 = arith.constant 0 : index
    %105 = vector.load %arg5[%c0_35, %c0_36, %c0_37] : memref<1x2x4xf32, #tpu.memory_space<vmem>>, vector<1x2x4xf32>
    %106 = vector.shape_cast %105 : vector<1x2x4xf32> to vector<2x4xf32>
    %107 = vector.shape_cast %104 : vector<2x4xf32> to vector<1x2x4xf32>
    tpu.vector_store %arg5[%c0_35, %c0_36, %c0_37], %107 {strides = array<i32>} : memref<1x2x4xf32, #tpu.memory_space<vmem>>, vector<1x2x4xf32>,
    %108 = arith.truncf %97 : vector<4x64xf32> to vector<4x64xbf16>
    %c0_38 = arith.constant 0 : index
    %c0_39 = arith.constant 0 : index
    %c0_40 = arith.constant 0 : index
    %109 = vector.load %arg4[%c0_38, %c0_39, %c0_40] : memref<1x4x64xbf16, #tpu.memory_space<vmem>>, vector<1x4x64xbf16>
    %110 = vector.shape_cast %109 : vector<1x4x64xbf16> to vector<4x64xbf16>
    %111 = vector.shape_cast %108 : vector<4x64xbf16> to vector<1x4x64xbf16>
    tpu.vector_store %arg4[%c0_38, %c0_39, %c0_40], %111 {strides = array<i32>} : memref<1x4x64xbf16, #tpu.memory_space<vmem>>, vector<1x4x64xbf16>,
    return
  }
  func.func @transform_0(%arg0: i32) -> (i32, i32, i32) {
    %c0_i32 = arith.constant 0 : i32
    %c0_i32_0 = arith.constant 0 : i32
    %c0_i32_1 = arith.constant 0 : i32
    return %arg0, %c0_i32, %c0_i32_0 : i32, i32, i32
  }
  func.func @transform_1(%arg0: i32) -> (i32, i32) {
    %c0_i32 = arith.constant 0 : i32
    %c0_i32_0 = arith.constant 0 : i32
    %c0_i32_1 = arith.constant 0 : i32
    return %c0_i32, %c0_i32_0 : i32, i32
  }
  func.func @transform_2(%arg0: i32) -> (i32, i32, i32) {
    %c0_i32 = arith.constant 0 : i32
    %c0_i32_0 = arith.constant 0 : i32
    %c0_i32_1 = arith.constant 0 : i32
    %c0_i32_2 = arith.constant 0 : i32
    return %c0_i32, %c0_i32_0, %c0_i32_1 : i32, i32, i32
  }
  func.func @transform_3(%arg0: i32) -> (i32, i32, i32) {
    %c0_i32 = arith.constant 0 : i32
    %c0_i32_0 = arith.constant 0 : i32
    %c0_i32_1 = arith.constant 0 : i32
    return %arg0, %c0_i32, %c0_i32_0 : i32, i32, i32
  }
  func.func @transform_4(%arg0: i32) -> (i32, i32, i32) {
    %c0_i32 = arith.constant 0 : i32
    %c0_i32_0 = arith.constant 0 : i32
    %c0_i32_1 = arith.constant 0 : i32
    return %arg0, %c0_i32, %c0_i32_0 : i32, i32, i32
  }
}

module attributes {stable_mosaic.version = 11 : i64} {
  func.func @_residual_kernel(%arg0: i32, %arg1: memref<1x16x64xf32, #tpu.memory_space<vmem>>, %arg2: memref<1x16x64xbf16, #tpu.memory_space<vmem>>, %arg3: memref<16x2xf32, #tpu.memory_space<vmem>>, %arg4: memref<1x16x64xf32, #tpu.memory_space<vmem>>) attributes {dimension_semantics = [#tpu.dimension_semantics<parallel>], iteration_bounds = array<i64: 2>, scalar_prefetch = 0 : i64, scratch_operands = 0 : i64, tpu.core_type = #tpu.core_type<tc>, window_params = [{transform_indices = @transform_0, window_bounds = array<i64: 1, 16, 64>}, {transform_indices = @transform_1, window_bounds = array<i64: 1, 16, 64>}, {pipeline_mode = #tpu.pipeline_mode<synchronous>, transform_indices = @transform_2, window_bounds = array<i64: 16, 2>}, {transform_indices = @transform_3, window_bounds = array<i64: 1, 16, 64>}]} {
    %c0 = arith.constant 0 : index
    %c0_0 = arith.constant 0 : index
    %c0_1 = arith.constant 0 : index
    %0 = vector.load %arg2[%c0, %c0_0, %c0_1] : memref<1x16x64xbf16, #tpu.memory_space<vmem>>, vector<1x16x64xbf16>
    %1 = vector.shape_cast %0 : vector<1x16x64xbf16> to vector<16x64xbf16>
    %2 = arith.extf %1 : vector<16x64xbf16> to vector<16x64xf32>
    %c0_2 = arith.constant 0 : index
    %c0_3 = arith.constant 0 : index
    %3 = vector.load %arg3[%c0_2, %c0_3] : memref<16x2xf32, #tpu.memory_space<vmem>>, vector<16x2xf32>
    %4 = vector.extract_strided_slice %3 {offsets = [0, 0], sizes = [16, 1], strides = [1, 1]} : vector<16x2xf32> to vector<16x1xf32>
    %5 = vector.broadcast %4 : vector<16x1xf32> to vector<16x64xf32>
    %6 = arith.mulf %2, %5 : vector<16x64xf32>
    %7 = vector.extract_strided_slice %3 {offsets = [0, 1], sizes = [16, 1], strides = [1, 1]} : vector<16x2xf32> to vector<16x1xf32>
    %8 = vector.broadcast %7 : vector<16x1xf32> to vector<16x64xf32>
    %9 = arith.addf %6, %8 : vector<16x64xf32>
    %c0_4 = arith.constant 0 : index
    %c0_5 = arith.constant 0 : index
    %c0_6 = arith.constant 0 : index
    %10 = vector.load %arg1[%c0_4, %c0_5, %c0_6] : memref<1x16x64xf32, #tpu.memory_space<vmem>>, vector<1x16x64xf32>
    %11 = vector.shape_cast %10 : vector<1x16x64xf32> to vector<16x64xf32>
    %12 = arith.addf %11, %9 : vector<16x64xf32>
    %c0_7 = arith.constant 0 : index
    %c0_8 = arith.constant 0 : index
    %c0_9 = arith.constant 0 : index
    %13 = vector.load %arg4[%c0_7, %c0_8, %c0_9] : memref<1x16x64xf32, #tpu.memory_space<vmem>>, vector<1x16x64xf32>
    %14 = vector.shape_cast %13 : vector<1x16x64xf32> to vector<16x64xf32>
    %15 = vector.shape_cast %12 : vector<16x64xf32> to vector<1x16x64xf32>
    tpu.vector_store %arg4[%c0_7, %c0_8, %c0_9], %15 {strides = array<i32>} : memref<1x16x64xf32, #tpu.memory_space<vmem>>, vector<1x16x64xf32>,
    return
  }
  func.func @transform_0(%arg0: i32) -> (i32, i32, i32) {
    %c0_i32 = arith.constant 0 : i32
    %c0_i32_0 = arith.constant 0 : i32
    %c0_i32_1 = arith.constant 0 : i32
    return %arg0, %c0_i32, %c0_i32_0 : i32, i32, i32
  }
  func.func @transform_1(%arg0: i32) -> (i32, i32, i32) {
    %c0_i32 = arith.constant 0 : i32
    %c0_i32_0 = arith.constant 0 : i32
    %c0_i32_1 = arith.constant 0 : i32
    return %arg0, %c0_i32, %c0_i32_0 : i32, i32, i32
  }
  func.func @transform_2(%arg0: i32) -> (i32, i32) {
    %c0_i32 = arith.constant 0 : i32
    %c0_i32_0 = arith.constant 0 : i32
    %c0_i32_1 = arith.constant 0 : i32
    return %c0_i32, %c0_i32_0 : i32, i32
  }
  func.func @transform_3(%arg0: i32) -> (i32, i32, i32) {
    %c0_i32 = arith.constant 0 : i32
    %c0_i32_0 = arith.constant 0 : i32
    %c0_i32_1 = arith.constant 0 : i32
    return %arg0, %c0_i32, %c0_i32_0 : i32, i32, i32
  }
}

</mosaic_0001>

<bundles_post_ra>
// kernel: bottleneck_forward.4
= control target key start
LH: loop header
LB: loop body
LE: loop exit
PB: predicated region body
PF: predicated region fallthrough
CT: control target
= control target key end

     0   :  { %s421_s12 = smov 0   ;;  %s448_s0 = inlined_call_operand.vmem [shape: f32[2,16,64], index: 0, kind: input, shape index: {}]   ;;  %s449_s1 = inlined_call_operand.vmem [shape: bf16[4,16], index: 1, kind: input, shape index: {}]   ;;  %s450_s2 = inlined_call_operand.vmem [shape: bf16[2,4,64], index: 2, kind: output, shape index: {0}]   ;;  %s451_s3 = inlined_call_operand.vmem [shape: f32[2,2,4], index: 3, kind: output, shape index: {1}]  }
   0x1 LB: > { %s360_s13 = sadd.s32 4294967295, %s397_s12   ;;  %p364_p0 = scmp.ge.s32.totalorder %s397_s12, 1  ;;  %s397_s12 = sphi %s421_s12, %s14_s12  }
   0x2   : > { %p140_p1 = scmp.lt.s32.totalorder %s397_s12, 3 }
   0x4   : > { %p141_p2 = pnand %p364_p0, %p140_p1 }
   0x5   : > { %p167_p3 = scmp.lt.s32.totalorder (!%p141_p2), %s360_s13, 1 }
   0x6   : > { %144 = sbr.rel (%p141_p2) target bundleno = 483 (0x1e3), region = 28 }
   0xb   : > { %v399_v0 = vmov 0.0   ;;  %vm400_vm0 = vmmov 0   ;;  %s453_s13 = smov (!%p167_p3, %s360_s13), 1  ;;  %v184_v4 = vld [vmem:[%s449_s1] sm:$0x3]  ;;  %vm185_vm1 = vcmask 130048  }
   0xc   : > { %375 = vmatprep.subr.bf16.mxu0 %v399_v0  ;;  %377 = vmatprep.mubr.msk.bf16.mxu0 %vm400_vm0, %v399_v0  ;;  %s372_s14 = sshll.u32 %s453_s13, 4  ;;  %s367_s20 = sshll.u32 %s453_s13, 1  ;;  %vm229_vm2 = vcmask 519168   ;;  %vm274_vm3 = vcmask 517120   ;;  %vm237_vm4 = vcmask 7168   ;;  %vm271_vm5 = vcmask 25600  }
   0xd   : > { %s171_s17 = scalar_lea.vmem %s448_s0, %s372_s14  ;;  %s175_s23 = scalar_lea.vmem %s450_s2, %s367_s20 }
   0xe   : > { %v181_v1 = vld [vmem:[%s171_s17] sm:$0xff]  ;;  %v182_v2 = vld [vmem:[%s171_s17 + $0x8] sm:$0xff]  ;;  %s179_s26 = scalar_lea.vmem %s451_s3, %s367_s20 }
   0xf   : > { %v183_v3 = vpack.c.bf16 %v182_v2, %v181_v1 }
  0x11   : > { %376 = vmatpush3.bf16.msra.mxu0 %v183_v3 }
  0x14   : > { %378 = vmatmul.mubr.msk.bf16.vlgmr.msra.gmra.mxu0 %vm185_vm1, %v184_v4 }
  0xd4   : > { %v223_v5 = vpop.f32.mrf.mxu0 }
  0xd5   : > { %v273_v6 = vpack.c.bf16 %v223_v5, %v223_v5  ;;  %v230_v7 = vsel %vm229_vm2, %v223_v5, 0.0  ;;  %v233_v8 = vmul.f32 %v223_v5, %v223_v5 }
  0xd6   : > { %231 = vadd.xlane.f32.xlu0 %v230_v7  ;;  %v379_v9 = vpop.f32.mrf.mxu0 }
  0xd7   : > { %275 = vst.msk [vmem:[%s175_s23] sm:$0x3] %vm274_vm3, %v273_v6  ;;  %v234_v11 = vsel %vm229_vm2, %v233_v8, 0.0 }
  0xd8   : > { %v226_v10 = vpop.f32.mrf.mxu0 }
  0xda   : > { %235 = vadd.xlane.f32.xlu0 %v234_v11  ;;  %v380_v12 = vpop.f32.mrf.mxu0 }
 0x15f   : > { %v232_v13 = vpop.xlane.xlu0 %231 }
 0x163   : > { %v236_v14 = vpop.xlane.xlu0 %235 }
 0x164   : > { %v238_v15 = vsel %vm237_vm4, %v232_v13, %v236_v14 }
 0x165   : > { %239 = vxpose.xlu1.b32.start.end [1/1] (short) (narrow) %v238_v15, 8 }
 0x1e1   : > { %v255_v16 = vpop.trf.xlu1 }
 0x1e2   : > { %272 = vst.msk [vmem:[%s179_s26] sm:$0x3] %vm271_vm5, %v255_v16 }
 0x1e3 PF: > { %s14_s12 = sadd.s32 1, %s397_s12  }
 0x1e4   : > { %p11_p4 = scmp.ge.s32.totalorder %s14_s12, 4  }
 0x1e6   :  { %13 = sbr.rel (!%p11_p4) target bundleno = 1 (0x1), region = 70 }

// kernel: bottleneck_forward.6
= control target key start
LH: loop header
LB: loop body
LE: loop exit
PB: predicated region body
PF: predicated region fallthrough
CT: control target
= control target key end

     0   :  { %s506_s15 = smov 0   ;;  %s544_s0 = inlined_call_operand.vmem [shape: bf16[2,4,64], index: 0, kind: input, shape index: {}]   ;;  %s545_s1 = inlined_call_operand.vmem [shape: f32[4,2], index: 1, kind: input, shape index: {}]   ;;  %s546_s2 = inlined_call_operand.vmem [shape: bf16[16,4], index: 2, kind: input, shape index: {}]   ;;  %s547_s3 = inlined_call_operand.vmem [shape: bf16[2,16,64], index: 3, kind: output, shape index: {0}]   ;;  %s548_s4 = inlined_call_operand.vmem [shape: f32[2,2,16], index: 4, kind: output, shape index: {1}]  }
   0x1 LB: > { %s428_s16 = sadd.s32 4294967295, %s475_s15   ;;  %p432_p0 = scmp.ge.s32.totalorder %s475_s15, 1  ;;  %s475_s15 = sphi %s506_s15, %s15_s15  }
   0x2   : > { %p164_p1 = scmp.lt.s32.totalorder %s475_s15, 3 }
   0x4   : > { %p165_p2 = pnand %p432_p0, %p164_p1 }
   0x5   : > { %p193_p3 = scmp.lt.s32.totalorder (!%p165_p2), %s428_s16, 1 }
   0x6   : > { %168 = sbr.rel (%p165_p2) target bundleno = 615 (0x267), region = 32 }
   0xb   : > { %v209_v0 = vld [vmem:[%s545_s1] sm:$0xf]  ;;  %v477_v1 = vmov 0   ;;  %v478_v2 = vmov 1   ;;  %v479_v3 = vmov 0.0   ;;  %vm480_vm0 = vmmov 0  }
   0xc   : > { %466 = vset.pattern.permute.xlu0 %v477_v1  ;;  %448 = vmatprep.subr.bf16.mxu0 %v479_v3  ;;  %s550_s16 = smov (!%p193_p3, %s428_s16), 1  ;;  %vm234_vm1 = vcmask 1041408   ;;  %v468_v13 = vld [vmem:[%s546_s2] sm:$0xff]   ;;  %vm230_vm2 = vcmask 31744   ;;  %vm279_vm3 = vcmask 523264   ;;  %vm339_vm4 = vcmask 519168  }
   0xd   : > { %212 = vperm.xlu0 %466, %v209_v0   ;;  %450 = vmatprep.mubr.msk.bf16.mxu0 %vm480_vm0, %v479_v3  ;;  %s433_s19 = sshll.u32 %s550_s16, 1  ;;  %s443_s25 = sshll.u32 %s550_s16, 3  ;;  %vm294_vm5 = vcmask 7168   ;;  %vm329_vm6 = vcmask 123904  }
   0xe   : > { %s196_s22 = scalar_lea.vmem %s544_s0, %s433_s19  ;;  %s201_s28 = scalar_lea.vmem %s547_s3, %s443_s25 }
   0xf   : > { %v207_v4 = vld [vmem:[%s196_s22] sm:$0x3]  ;;  %s205_s5 = scalar_lea.vmem %s548_s4, %s433_s19 }
  0x10   : > { %v208_v6 = vunpack.c.l.bf16 %v207_v4 }
  0x11   : > { %467 = vset.pattern.permute.xlu0 %v478_v2 }
  0x12   : > { %217 = vperm.xlu0 %467, %v209_v0  }
  0x88   : > { %v213_v5 = vpop.permute.xlu0 %212 }
  0x89   : > { %v215_v7 = vmul.f32 %v213_v5, %v208_v6 }
  0x8d   : > { %v218_v8 = vpop.permute.xlu0 %217 }
  0x8e   : > { %v220_v9 = vadd.f32 %v218_v8, %v215_v7 }
  0x90   : > { %v221_v10 = vmax.f32 %v220_v9, 0.0 }
  0x92   : > { %v222_v11 = vpack.c.bf16 %v221_v10, %v221_v10 }
  0x94   : > { %v236_v12 = vsel %vm234_vm1, %v222_v11, 0 }
  0x95   : > { %449 = vmatpush3.bf16.msra.mxu0 %v236_v12 }
  0x98   : > { %451 = vmatmul.mubr.msk.bf16.vlgmr.msra.gmra.mxu0 %vm230_vm2, %v468_v13 }
 0x158   : > { %v272_v14 = vpop.f32.mrf.mxu0 }
 0x159   : > { %v444_v15 = vpack.c.bf16 %v272_v14, %v272_v14  ;;  %v280_v16 = vsel %vm279_vm3, %v272_v14, 0.0  ;;  %v286_v17 = vmul.f32 %v272_v14, %v272_v14 }
 0x15a   : > { %281 = vadd.xlane.f32.xlu1 %v280_v16  ;;  %v452_v18 = vpop.f32.mrf.mxu0 }
 0x15b   : > { %340 = vst.msk [vmem:[%s201_s28] sm:$0xf] %vm339_vm4, %v444_v15  ;;  %v288_v21 = vsel %vm279_vm3, %v286_v17, 0.0 }
 0x15c   : > { %v275_v19 = vpop.f32.mrf.mxu0 }
 0x15d   : > { %v445_v20 = vpack.c.bf16 %v275_v19, %v275_v19  ;;  %v287_v22 = vmul.f32 %v275_v19, %v275_v19  ;;  %v283_v25 = vsel %vm279_vm3, %v275_v19, 0.0 }
 0x15e   : > { %289 = vadd.xlane.f32.xlu1 %v288_v21  ;;  %v453_v23 = vpop.f32.mrf.mxu0 }
 0x15f   : > { %341 = vst.msk [vmem:[%s201_s28 + $0x4] sm:$0xf] %vm339_vm4, %v445_v20  ;;  %v291_v24 = vsel %vm279_vm3, %v287_v22, 0.0 }
 0x160   : > { %292 = vadd.xlane.f32.xlu0 %v291_v24 }
 0x162   : > { %284 = vadd.xlane.f32.xlu1 %v283_v25 }
 0x1e3   : > { %v282_v26 = vpop.xlane.xlu1 %281 }
 0x1e7   : > { %v290_v27 = vpop.xlane.xlu1 %289 }
 0x1e8   : > { %v295_v28 = vsel %vm294_vm5, %v282_v26, %v290_v27 }
 0x1e9   : > { %297 = vxpose.xlu1.b32.start [1/2] (short) (narrow) %v295_v28, 8  ;;  %v293_v29 = vpop.xlane.xlu0 %292 }
 0x1eb   : > { %v285_v30 = vpop.xlane.xlu1 %284 }
 0x1ec   : > { %v296_v31 = vsel %vm294_vm5, %v285_v30, %v293_v29 }
 0x1ed   : > { %298 = vxpose.xlu1.b32.end [2/2] (short) (narrow) %v296_v31, 8 }
 0x265   : > { %v313_v32 = vpop.trf.xlu1 }
 0x266   : > { %330 = vst.msk [vmem:[%s205_s5] sm:$0x3] %vm329_vm6, %v313_v32 }
 0x267 PF: > { %s15_s15 = sadd.s32 1, %s475_s15  }
 0x268   : > { %p12_p4 = scmp.ge.s32.totalorder %s15_s15, 4  }
 0x26a   :  { %14 = sbr.rel (!%p12_p4) target bundleno = 1 (0x1), region = 74 }

// kernel: bottleneck_forward.7
= control target key start
LH: loop header
LB: loop body
LE: loop exit
PB: predicated region body
PF: predicated region fallthrough
CT: control target
= control target key end

     0   :  { %s356_s12 = smov 0   ;;  %s382_s0 = inlined_call_operand.vmem [shape: f32[2,16,64], index: 0, kind: input, shape index: {}]   ;;  %s383_s1 = inlined_call_operand.vmem [shape: bf16[2,16,64], index: 1, kind: input, shape index: {}]   ;;  %s384_s2 = inlined_call_operand.vmem [shape: f32[16,2], index: 2, kind: input, shape index: {}]   ;;  %s385_s3 = inlined_call_operand.vmem [shape: f32[2,16,64], index: 3, kind: output, shape index: {}]  }
   0x1 LB: > { %s293_s13 = sadd.s32 4294967295, %s332_s12   ;;  %p297_p0 = scmp.ge.s32.totalorder %s332_s12, 1  ;;  %s332_s12 = sphi %s356_s12, %s13_s12  }
   0x2   : > { %p147_p1 = scmp.lt.s32.totalorder %s332_s12, 3 }
   0x4   : > { %p148_p2 = pnand %p297_p0, %p147_p1 }
   0x5   : > { %p176_p3 = scmp.lt.s32.totalorder (!%p148_p2), %s293_s13, 1 }
   0x6   : > { %151 = sbr.rel (%p148_p2) target bundleno = 148 (0x94), region = 32 }
   0xb   : > { %v195_v0 = vld [vmem:[%s384_s2] sm:$0xff]  ;;  %v334_v1 = vmov 1   ;;  %v335_v2 = vmov 0   ;;  %v196_v3 = vld [vmem:[%s384_s2 + $0x8] sm:$0xff]  ;;  %s387_s13 = smov (!%p176_p3, %s293_s13), 1  ;;  %vm223_vm0 = vcmask 523264  }
   0xc   : > { %324 = vset.pattern.permute.xlu1 %v334_v1  ;;  %323 = vset.pattern.permute.xlu0 %v335_v2  ;;  %s307_s18 = sshll.u32 %s387_s13, 3  ;;  %s306_s22 = sshll.u32 %s387_s13, 4 }
   0xd   : > { %210 = vperm.xlu1 %324, %v195_v0   ;;  %199 = vperm.xlu0 %323, %v195_v0   ;;  %s185_s21 = scalar_lea.vmem %s383_s1, %s307_s18  ;;  %s180_s25 = scalar_lea.vmem %s382_s0, %s306_s22 }
   0xe   : > { %v310_v4 = vld [vmem:[%s185_s21] sm:$0xff]   ;;  %s190_s28 = scalar_lea.vmem %s385_s3, %s306_s22  ;;  %v220_v16 = vld [vmem:[%s180_s25 + $0x8] sm:$0xff] }
   0xf   : > { %v311_v5 = vunpack.c.l.bf16 %v310_v4  ;;  %v312_v9 = vunpack.c.h.bf16 %v310_v4  ;;  %v219_v10 = vld [vmem:[%s180_s25] sm:$0xff] }
  0x11   : > { %214 = vperm.xlu1 %324, %v196_v3   ;;  %204 = vperm.xlu0 %323, %v196_v3  }
  0x15   : > { %325 = vset.pattern.permute.xlu0 %v334_v1 }
  0x88   : > { %v211_v6 = vpop.permute.xlu1 %210  ;;  %v200_v7 = vpop.permute.xlu0 %199 }
  0x89   : > { %v207_v8 = vmul.f32 %v311_v5, %v200_v7 }
  0x8b   : > { %v217_v11 = vadd.f32 %v211_v6, %v207_v8 }
  0x8c   : > { %v205_v12 = vpop.permute.xlu0 %204  ;;  %v215_v15 = vpop.permute.xlu1 %214 }
  0x8d   : > { %v221_v13 = vadd.f32 %v219_v10, %v217_v11  ;;  %v208_v14 = vmul.f32 %v312_v9, %v205_v12 }
  0x8f   : > { %224 = vst.msk [vmem:[%s190_s28] sm:$0xff] %vm223_vm0, %v221_v13  ;;  %v218_v17 = vadd.f32 %v215_v15, %v208_v14 }
  0x91   : > { %v222_v18 = vadd.f32 %v220_v16, %v218_v17 }
  0x93   : > { %225 = vst.msk [vmem:[%s190_s28 + $0x8] sm:$0xff] %vm223_vm0, %v222_v18 }
  0x94 PF: > { %s13_s12 = sadd.s32 1, %s332_s12  }
  0x95   : > { %p10_p4 = scmp.ge.s32.totalorder %s13_s12, 4  }
  0x97   :  { %12 = sbr.rel (!%p10_p4) target bundleno = 1 (0x1), region = 65 }

// kernel: bottleneck_forward.5
= control target key start
LH: loop header
LB: loop body
LE: loop exit
PB: predicated region body
PF: predicated region fallthrough
CT: control target
= control target key end

     0   :  { %s704_s15 = smov 0   ;;  %s784_s0 = inlined_call_operand.vmem [shape: bf16[2,4,64], index: 0, kind: input, shape index: {}]   ;;  %s785_s1 = inlined_call_operand.vmem [shape: f32[4,2], index: 1, kind: input, shape index: {}]   ;;  %s786_s2 = inlined_call_operand.vmem [shape: bf16[3,4,12], index: 2, kind: input, shape index: {}]   ;;  %s787_s3 = inlined_call_operand.vmem [shape: bf16[2,4,64], index: 3, kind: output, shape index: {0}]   ;;  %s788_s4 = inlined_call_operand.vmem [shape: f32[2,2,4], index: 4, kind: output, shape index: {1}]  }
   0x1 LB: > { %s598_s16 = sadd.s32 4294967295, %s665_s15   ;;  %p602_p0 = scmp.ge.s32.totalorder %s665_s15, 1  ;;  %s665_s15 = sphi %s704_s15, %s15_s15  }
   0x2   : > { %p164_p1 = scmp.lt.s32.totalorder %s665_s15, 3 }
   0x4   : > { %p165_p2 = pnand %p602_p0, %p164_p1 }
   0x5   : > { %p192_p3 = scmp.lt.s32.totalorder (!%p165_p2), %s598_s16, 1  ;;  %s671_s23 = smov (!%p165_p2), 7  }
   0x6   : > { %168 = sbr.rel (%p165_p2) target bundleno = 751 (0x2ef), region = 32  ;;  %s672_s24 = smov (!%p165_p2), 127  }
   0x7   : > { %s673_s25 = smov (!%p165_p2), 120   ;;  %s674_s26 = smov (!%p165_p2), 1  }
   0x8   : > { %s675_s27 = smov (!%p165_p2), 121   ;;  %s676_s28 = smov (!%p165_p2), 8  }
   0x9   : > { %s677_s29 = smov (!%p165_p2), 9   ;;  %s678_s30 = smov (!%p165_p2), 119  }
   0xb   : > { %v207_v0 = vld [vmem:[%s785_s1] sm:$0xf]  ;;  %v667_v1 = vmov 0   ;;  %v668_v2 = vmov 1   ;;  %s794_s16 = smov (!%p192_p3, %s598_s16), 1  ;;  %v669_v9 = vmov 0.0   ;;  %v221_v12 = vlaneseq }
   0xc   : > { %657 = vset.pattern.permute.xlu0 %v667_v1  ;;  %s715_s19 = sshll.u32 %s794_s16, 1  ;;  %619 = vmatprep.subr.bf16.mxu0 %v669_v9  ;;  %vm670_vm0 = vmmov 0   ;;  %vm285_vm2 = vcmask 515072   ;;  %vm278_vm5 = vcmask 7168   ;;  %vm268_vm7 = vcmask 1041408  }
   0xd   : > { %210 = vperm.xlu0 %657, %v207_v0   ;;  %s195_s22 = scalar_lea.vmem %s784_s0, %s715_s19  ;;  %625 = vmatprep.subr.bf16.mxu1 %v669_v9  ;;  %v222_v13 = vand.u32 127, %v221_v12  ;;  %vm256_vm8 = vcmask 56320   ;;  %vm272_vm9 = vcmask 1043456   ;;  %vm304_vm10 = vcmask 1045504   ;;  %v606_v33 = vld [vmem:[%s786_s2 + $0x2] sm:$0x3]  ;;  %s199_s13 = scalar_lea.vmem %s787_s3, %s715_s19 }
   0xe   : > { %v205_v3 = vld [vmem:[%s195_s22] sm:$0x3]  ;;  %621 = vmatprep.mubr.msk.bf16.mxu0 %vm670_vm0, %v669_v9  ;;  %627 = vmatprep.mubr.msk.bf16.mxu1 %vm670_vm0, %v669_v9  ;;  %vm251_vm11 = vcmask 64512   ;;  %vm240_vm12 = vcmask 72704   ;;  %vm300_vm13 = vcmask 97280   ;;  %vm394_vm14 = vcmask 465920   ;;  %s203_s17 = scalar_lea.vmem %s788_s4, %s715_s19 }
   0xf   : > { %v206_v5 = vunpack.c.l.bf16 %v205_v3  ;;  %v227_v14 = vand.u32 7, %v222_v13  ;;  %vm401_vm15 = vcmask 457728   ;;  %v275_v51 = vld [vmem:[%s786_s2] sm:$0x3]  ;;  %v609_v56 = vld [vmem:[%s786_s2 + $0x4] sm:$0x3] }
  0x11   : > { %658 = vset.pattern.permute.xlu0 %v668_v2  ;;  %vm236_vm1 = vcmp.le.s32.totalorder %v227_v14, 6  ;;  %vm235_vm4 = vcmp.ge.s32.totalorder %v227_v14, 1 }
  0x12   : > { %215 = vperm.xlu0 %658, %v207_v0   ;;  %vm727_vm3 = vmpackc.low %vm236_vm1, %vm236_vm1  ;;  %vm406_vm1 = vcmask 449536  }
  0x13   : > { %vm733_vm6 = vmpackc.low %vm235_vm4, %vm235_vm4 }
  0x88   : > { %v211_v4 = vpop.permute.xlu0 %210 }
  0x89   : > { %v213_v6 = vmul.f32 %v211_v4, %v206_v5 }
  0x8d   : > { %v216_v7 = vpop.permute.xlu0 %215 }
  0x8e   : > { %v218_v8 = vadd.f32 %v216_v7, %v213_v6 }
  0x90   : > { %v219_v10 = vmax.f32 %v218_v8, 0.0 }
  0x92   : > { %v220_v11 = vpack.c.bf16 %v219_v10, %v219_v10 }
  0x94   : > { %254 = vrot.lane.b32.xlu0 %v220_v11, %s671_s23  ;;  %283 = vrot.lane.b32.xlu1 %v220_v11, %s672_s24  ;;  %v290_v24 = vrot.slane %v220_v11, 6 }
  0x98   : > { %399 = vrot.lane.b32.xlu0 %v220_v11, %s673_s25  ;;  %276 = vrot.lane.b32.xlu1 %v220_v11, %s674_s26 }
  0x9c   : > { %392 = vrot.lane.b32.xlu0 %v220_v11, %s675_s27  ;;  %249 = vrot.lane.b32.xlu1 %v220_v11, %s676_s28 }
  0xa0   : > { %238 = vrot.lane.b32.xlu1 %v220_v11, %s677_s29 }
  0xa4   : > { %404 = vrot.lane.b32.xlu1 %v220_v11, %s678_s30 }
 0x106   : > { %v255_v16 = vpop.permute.xlu0 %254  ;;  %v284_v17 = vpop.permute.xlu1 %283 }
 0x107   : > { %v287_v18 = vsel %vm285_vm2, %v284_v17, 0  ;;  %v258_v28 = vsel %vm256_vm8, 0, %v255_v16  ;;  %vm512_vm2 = vcmask 517120  }
 0x108   : > { %v289_v19 = vsel %vm727_vm3, %v287_v18, 0  ;;  %v263_v34 = vsel %vm727_vm3, %v258_v28, 0 }
 0x109   : > { %v292_v25 = vrot.slane %v289_v19, 4  ;;  %v267_v39 = vrot.slane %v263_v34, 4 }
 0x10a   : > { %v277_v21 = vpop.permute.xlu1 %276  ;;  %v400_v22 = vpop.permute.xlu0 %399 }
 0x10b   : > { %v280_v23 = vsel %vm278_vm5, 0, %v277_v21  ;;  %v403_v42 = vsel %vm401_vm15, %v400_v22, 0 }
 0x10c   : > { %v282_v26 = vsel %vm733_vm6, %v280_v23, 0  ;;  %v412_v49 = vrot.slane %v403_v42, 6 }
 0x10d   : > { %v295_v27 = vsel %vm268_vm7, %v282_v26, %v290_v24 }
 0x10e   : > { %v250_v29 = vpop.permute.xlu1 %249  ;;  %v297_v30 = vsel %vm272_vm9, %v295_v27, %v292_v25  ;;  %v393_v35 = vpop.permute.xlu0 %392 }
 0x10f   : > { %v305_v31 = vsel %vm304_vm10, %v297_v30, 0  ;;  %v253_v32 = vsel %vm251_vm11, 0, %v250_v29  ;;  %v396_v40 = vsel %vm394_vm14, %v393_v35, 0 }
 0x110   : > { %620 = vmatpush3.bf16.msra.mxu0 %v305_v31  ;;  %v265_v37 = vrot.slane %v253_v32, 6  ;;  %v398_v46 = vsel %vm733_vm6, %v396_v40, 0 }
 0x111   : > { %631 = vmatprep.subr.bf16.mxu0 %v669_v9  ;;  %v417_v53 = vsel %vm268_vm7, %v398_v46, %v412_v49 }
 0x112   : > { %v239_v36 = vpop.permute.xlu1 %238 }
 0x113   : > { %v243_v38 = vsel %vm240_vm12, 0, %v239_v36  ;;  %622 = vmatmul.mubr.msk.bf16.vlgmr.msra.gmra.mxu0 %vm300_vm13, %v606_v33 }
 0x114   : > { %v248_v41 = vsel %vm733_vm6, %v243_v38, 0  ;;  %633 = vmatprep.mubr.msk.bf16.mxu0 %vm670_vm0, %v669_v9  ;;  %vm468_vm0 = vcmask 519168  }
 0x115   : > { %v271_v43 = vsel %vm268_vm7, %v248_v41, %v265_v37 }
 0x116   : > { %v405_v44 = vpop.permute.xlu1 %404  ;;  %v274_v45 = vsel %vm272_vm9, %v271_v43, %v267_v39 }
 0x117   : > { %v408_v47 = vsel %vm406_vm1, %v405_v44, 0  ;;  %v350_v48 = vsel %vm304_vm10, %v274_v45, 0 }
 0x118   : > { %v410_v50 = vsel %vm727_vm3, %v408_v47, 0  ;;  %626 = vmatpush3.bf16.msra.mxu1 %v350_v48  ;;  %vm509_vm3 = vcmask 25600  }
 0x119   : > { %v414_v52 = vrot.slane %v410_v50, 4 }
 0x11b   : > { %628 = vmatmul.mubr.msk.bf16.vlgmr.msra.gmra.mxu1 %vm300_vm13, %v275_v51  ;;  %v419_v54 = vsel %vm272_vm9, %v417_v53, %v414_v52 }
 0x11c   : > { %v425_v55 = vsel %vm304_vm10, %v419_v54, 0 }
 0x11d   : > { %632 = vmatpush3.bf16.msra.mxu0 %v425_v55 }
 0x120   : > { %634 = vmatmul.mubr.msk.bf16.vlgmr.msra.gmra.mxu0 %vm300_vm13, %v609_v56 }
 0x1d3   : > { %v341_v57 = vpop.f32.mrf.mxu0 }
 0x1d5   : > { %v623_v58 = vpop.f32.mrf.mxu0 }
 0x1d7   : > { %v344_v59 = vpop.f32.mrf.mxu0 }
 0x1d9   : > { %v624_v60 = vpop.f32.mrf.mxu0 }
 0x1db   : > { %v386_v61 = vpop.f32.mrf.mxu1 }
 0x1dc   : > { %v387_v63 = vadd.f32 %v386_v61, %v341_v57 }
 0x1dd   : > { %v629_v62 = vpop.f32.mrf.mxu1 }
 0x1df   : > { %v389_v0 = vpop.f32.mrf.mxu1 }
 0x1e0   : > { %v461_v1 = vpop.f32.mrf.mxu0 }
 0x1e1   : > { %v467_v2 = vadd.f32 %v461_v1, %v387_v63  ;;  %v630_v3 = vpop.f32.mrf.mxu1 }
 0x1e2   : > { %v635_v4 = vpop.f32.mrf.mxu0 }
 0x1e3   : > { %v511_v5 = vpack.c.bf16 %v467_v2, %v467_v2  ;;  %v469_v6 = vsel %vm468_vm0, %v467_v2, 0.0  ;;  %v472_v7 = vmul.f32 %v467_v2, %v467_v2 }
 0x1e4   : > { %470 = vadd.xlane.f32.xlu1 %v469_v6  ;;  %v464_v8 = vpop.f32.mrf.mxu0 }
 0x1e5   : > { %513 = vst.msk [vmem:[%s199_s13] sm:$0x3] %vm512_vm2, %v511_v5  ;;  %v473_v9 = vsel %vm468_vm0, %v472_v7, 0.0 }
 0x1e6   : > { %474 = vadd.xlane.f32.xlu0 %v473_v9  ;;  %v636_v10 = vpop.f32.mrf.mxu0 }
 0x26d   : > { %v471_v11 = vpop.xlane.xlu1 %470 }
 0x26f   : > { %v475_v12 = vpop.xlane.xlu0 %474 }
 0x270   : > { %v476_v13 = vsel %vm278_vm5, %v471_v11, %v475_v12 }
 0x271   : > { %477 = vxpose.xlu0.b32.start.end [1/1] (short) (narrow) %v476_v13, 8 }
 0x2ed   : > { %v493_v14 = vpop.trf.xlu0 }
 0x2ee   : > { %510 = vst.msk [vmem:[%s203_s17] sm:$0x3] %vm509_vm3, %v493_v14 }
 0x2ef PF: > { %s15_s15 = sadd.s32 1, %s665_s15  }
 0x2f0   : > { %p12_p4 = scmp.ge.s32.totalorder %s15_s15, 4  }
 0x2f2   :  { %14 = sbr.rel (!%p12_p4) target bundleno = 1 (0x1), region = 76 }

</bundles_post_ra>
